<compile_context>
chip_gen: v5e
topology: v5e:2x2
jax: 0.10.0
libtpu: 0.0.40
codegen_flags: <defaults>
</compile_context>

<pallas_src>
import math
from functools import partial

import jax
import jax.numpy as jnp
from jax.experimental import pallas as pl
from jax.experimental.pallas import tpu as pltpu


def _sdpa_kernel(q_ref, k_ref, v_ref, mask_ref, ctx_ref, attn_ref, *,
                 scale, pv_bf16):
    """One (batch-block, query-tile) per grid step: QK^T -> mask -> softmax -> PV."""
    q = q_ref[...]        # (BB, TQ, Dk)
    k = k_ref[...]        # (BB, Lk, Dk)
    v = v_ref[...]        # (BB, Lk, Dv)
    mask = mask_ref[...]  # (BB, TQ, Lk) int8, nonzero == masked

    # Scale q before the matmul: Lq*Dk VPU multiplies instead of Lq*Lk.
    if scale is not None:
        q = q * jnp.asarray(scale, q.dtype)

    # scores = q @ k^T (batched over BB), contracting Dk; no explicit transpose.
    scores = jnp.einsum("bqd,bkd->bqk", q, k,
                        preferred_element_type=jnp.float32)

    # torch.masked_fill_(attn_mask, -1000000.0): replace (not add) at masked spots.
    scores = jnp.where(mask != 0, jnp.float32(-1e6), scores)

    # Numerically-stable softmax along the key axis.
    m = jnp.max(scores, axis=-1, keepdims=True)
    e = jnp.exp(scores - m)
    denom = jnp.sum(e, axis=-1, keepdims=True)
    inv = pl.reciprocal(denom)          # exact; approx=True if tolerance allows
    attn = e * inv

    # TODO(synk): nn.Dropout(attention_dropout) with the module default p=0.0 is
    # the identity; a nonzero-p path would use pltpu.prng_seed /
    # pltpu.prng_random_bits to build the keep mask in-kernel.

    if pv_bf16:
        ctx = jnp.einsum("bqk,bkd->bqd",
                         attn.astype(jnp.bfloat16), v.astype(jnp.bfloat16),
                         preferred_element_type=jnp.float32)
    else:
        ctx = jnp.einsum("bqk,bkd->bqd", attn, v,
                         preferred_element_type=jnp.float32)

    # Lane-dense (Lk-wide) attention store; ctx store is Dv-wide.
    attn_ref[...] = attn.astype(attn_ref.dtype)
    ctx_ref[...] = ctx.astype(ctx_ref.dtype)
    # TODO(synk): for Dk=Dv<128 a lane-dense layout (packing heads along the
    # last axis in the caller) would further improve q/k/v/ctx bandwidth.


def _choose_blocks(B, Lq):
    """Pick (batch-block, query-tile) sizes: big enough to amortize per-step
    overhead, small enough for v7x VMEM, and keep >=2 parallel grid steps."""
    if Lq <= 512:
        block_q = Lq
    else:
        block_q = 512
        while Lq % block_q != 0 and block_q > 8:
            block_q //= 2
    n_q = pl.cdiv(Lq, block_q)

    block_b = 1
    if n_q == 1 and B > 2:
        # fold batch so each step carries ~256 query rows, keep grid >= 2
        target = max(1, 256 // max(Lq, 1))
        block_b = max(1, min(B // 2, target))
        while block_b > 1 and B % block_b != 0:
            block_b -= 1
    return block_b, block_q


def scaled_dot_product_attention(q, k, v, attn_mask, scale=None, *,
                                 pv_bf16=False, block_b=None, block_q=None):
    """q: (B, Lq, Dk), k: (B, Lk, Dk), v: (B, Lk, Dv), attn_mask: (B, Lq, Lk).

    Returns (context (B, Lq, Dv), attention (B, Lq, Lk)), matching the PyTorch
    module's forward().
    """
    B, Lq, Dk = q.shape
    Bk, Lk, Dk2 = k.shape
    Bv, Lkv, Dv = v.shape
    assert Bk == B and Bv == B and Dk2 == Dk and Lkv == Lk
    assert attn_mask.shape == (B, Lq, Lk)

    # int8 mask: 4x less HBM/VMEM than int32; kernel uses `mask != 0`.
    mask_i8 = attn_mask.astype(jnp.int8)

    bb_auto, bq_auto = _choose_blocks(B, Lq)
    block_b = bb_auto if block_b is None else block_b
    block_q = bq_auto if block_q is None else block_q
    assert B % block_b == 0 and Lq % block_q == 0

    grid = (B // block_b, Lq // block_q)

    # Rough scoped-VMEM need: double-buffered ins/outs + f32 score/exp temps.
    blk_bytes = (
        2 * block_b * (block_q * Dk + Lk * Dk + Lk * Dv) * 4      # q,k,v (x2 buf)
        + 2 * block_b * block_q * Lk * 1                          # mask  (x2 buf)
        + 2 * block_b * (block_q * Dv + block_q * Lk) * 4         # ctx, attn outs
        + 4 * block_b * block_q * Lk * 4)                         # score/exp temps
    vmem_limit = int(min(max(2 * blk_bytes, 8 << 20), 48 << 20))

    flops = 2 * B * Lq * Lk * (Dk + Dv)
    bytes_accessed = ((q.size + k.size + v.size) * 4 + mask_i8.size
                      + B * Lq * Dv * 4 + B * Lq * Lk * 4)
    cost = pl.CostEstimate(flops=flops, transcendentals=B * Lq * Lk,
                           bytes_accessed=bytes_accessed)

    kernel = partial(_sdpa_kernel, scale=scale, pv_bf16=pv_bf16)

    ctx, attn = pl.pallas_call(
        kernel,
        out_shape=(
            jax.ShapeDtypeStruct((B, Lq, Dv), jnp.float32),
            jax.ShapeDtypeStruct((B, Lq, Lk), jnp.float32),
        ),
        grid_spec=pltpu.PrefetchScalarGridSpec(
            num_scalar_prefetch=0,
            grid=grid,
            in_specs=[
                pl.BlockSpec((block_b, block_q, Dk), lambda b, qi: (b, qi, 0)),  # q
                pl.BlockSpec((block_b, Lk, Dk),      lambda b, qi: (b, 0, 0)),   # k
                pl.BlockSpec((block_b, Lk, Dv),      lambda b, qi: (b, 0, 0)),   # v
                pl.BlockSpec((block_b, block_q, Lk), lambda b, qi: (b, qi, 0)),  # mask
            ],
            out_specs=[
                pl.BlockSpec((block_b, block_q, Dv), lambda b, qi: (b, qi, 0)),  # ctx
                pl.BlockSpec((block_b, block_q, Lk), lambda b, qi: (b, qi, 0)),  # attn
            ],
        ),
        compiler_params=pltpu.CompilerParams(
            dimension_semantics=("parallel", "parallel"),
            vmem_limit_bytes=vmem_limit),
        cost_estimate=cost,
    )(q, k, v, mask_i8)
    return ctx, attn


def sdpa_reference(q, k, v, attn_mask, scale=None):
    """Pure-JAX reference mirroring the PyTorch forward()."""
    scores = jnp.einsum("bqd,bkd->bqk", q, k)
    if scale is not None:
        scores = scores * scale
    scores = jnp.where(attn_mask != 0, jnp.float32(-1e6), scores)
    attn = jax.nn.softmax(scores, axis=-1)
    ctx = jnp.einsum("bqk,bkd->bqd", attn, v)
    return ctx, attn


if __name__ == "__main__":
    # Small attention shapes: batch=2, query len=8, key len=128 (lane-dense),
    # head dim=32. scale = 1/sqrt(d_k) as in standard scaled dot-product attention.
    B, Lq, Lk, Dk, Dv = 2, 8, 128, 32, 32

    key = jax.random.PRNGKey(0)
    kq, kk, kv, km = jax.random.split(key, 4)
    q = jax.random.normal(kq, (B, Lq, Dk), jnp.float32)
    k = jax.random.normal(kk, (B, Lk, Dk), jnp.float32)
    v = jax.random.normal(kv, (B, Lk, Dv), jnp.float32)
    attn_mask = jax.random.bernoulli(km, 0.25, (B, Lq, Lk)).astype(jnp.int32)
    scale = 1.0 / math.sqrt(Dk)

    ctx, attn = scaled_dot_product_attention(q, k, v, attn_mask, scale=scale)
    ctx = jax.block_until_ready(ctx)
    attn = jax.block_until_ready(attn)

    ctx_ref, attn_ref = sdpa_reference(q, k, v, attn_mask, scale=scale)
    ctx_ref = jax.block_until_ready(ctx_ref)
    attn_ref = jax.block_until_ready(attn_ref)

    assert ctx.shape == (B, Lq, Dv), ctx.shape
    assert attn.shape == (B, Lq, Lk), attn.shape
    assert jnp.allclose(attn, attn_ref, atol=2e-5, rtol=2e-5), \
        float(jnp.max(jnp.abs(attn - attn_ref)))
    assert jnp.allclose(ctx, ctx_ref, atol=2e-5, rtol=2e-5), \
        float(jnp.max(jnp.abs(ctx - ctx_ref)))

    print("KERNEL_OK")
</pallas_src>

<mosaic_0001>
module attributes {stable_mosaic.version = 11 : i64} {
  func.func @_sdpa_kernel(%arg0: i32, %arg1: i32, %arg2: memref<1x8x32xf32, #tpu.memory_space<vmem>>, %arg3: memref<1x128x32xf32, #tpu.memory_space<vmem>>, %arg4: memref<1x128x32xf32, #tpu.memory_space<vmem>>, %arg5: memref<1x8x128xi8, #tpu.memory_space<vmem>>, %arg6: memref<1x8x32xf32, #tpu.memory_space<vmem>>, %arg7: memref<1x8x128xf32, #tpu.memory_space<vmem>>) attributes {dimension_semantics = [#tpu.dimension_semantics<parallel>, #tpu.dimension_semantics<parallel>], iteration_bounds = array<i64: 2, 1>, scalar_prefetch = 0 : i64, scratch_operands = 0 : i64, tpu.core_type = #tpu.core_type<tc>, window_params = [{transform_indices = @transform_0, window_bounds = array<i64: 1, 8, 32>}, {transform_indices = @transform_1, window_bounds = array<i64: 1, 128, 32>}, {transform_indices = @transform_2, window_bounds = array<i64: 1, 128, 32>}, {transform_indices = @transform_3, window_bounds = array<i64: 1, 8, 128>}, {transform_indices = @transform_4, window_bounds = array<i64: 1, 8, 32>}, {transform_indices = @transform_5, window_bounds = array<i64: 1, 8, 128>}]} {
    %c0 = arith.constant 0 : index
    %c0_0 = arith.constant 0 : index
    %c0_1 = arith.constant 0 : index
    %0 = vector.load %arg2[%c0, %c0_0, %c0_1] : memref<1x8x32xf32, #tpu.memory_space<vmem>>, vector<1x8x32xf32>
    %c0_2 = arith.constant 0 : index
    %c0_3 = arith.constant 0 : index
    %c0_4 = arith.constant 0 : index
    %1 = vector.load %arg3[%c0_2, %c0_3, %c0_4] : memref<1x128x32xf32, #tpu.memory_space<vmem>>, vector<1x128x32xf32>
    %c0_5 = arith.constant 0 : index
    %c0_6 = arith.constant 0 : index
    %c0_7 = arith.constant 0 : index
    %2 = vector.load %arg4[%c0_5, %c0_6, %c0_7] : memref<1x128x32xf32, #tpu.memory_space<vmem>>, vector<1x128x32xf32>
    %c0_8 = arith.constant 0 : index
    %c0_9 = arith.constant 0 : index
    %c0_10 = arith.constant 0 : index
    %3 = vector.load %arg5[%c0_8, %c0_9, %c0_10] : memref<1x8x128xi8, #tpu.memory_space<vmem>>, vector<1x8x128xi8>
    %cst = arith.constant 0.176776692 : f32
    %4 = vector.broadcast %cst : f32 to vector<1x8x32xf32>
    %5 = arith.mulf %0, %4 : vector<1x8x32xf32>
    "tpu.trace_start"() <{level = 10 : i32, message = "bqd,bkd->bqk"}> : () -> ()
    %cst_11 = arith.constant dense<0.000000e+00> : vector<1x8x128xf32>
    %6 = tpu.matmul %5, %1, %cst_11 {dimension_numbers = #tpu.dot_dimension_numbers<[2], [2], [1], [1], [0, 0, 0, 1, 1, 1], [0], [0]>} : vector<1x8x32xf32>, vector<1x128x32xf32>, vector<1x8x128xf32> -> vector<1x8x128xf32>
    %c0_i8 = arith.constant 0 : i8
    "tpu.trace_stop"() : () -> ()
    %7 = vector.broadcast %c0_i8 : i8 to vector<1x8x128xi8>
    %8 = arith.cmpi ne, %3, %7 : vector<1x8x128xi8>
    %cst_12 = arith.constant -1.000000e+06 : f32
    %9 = vector.broadcast %cst_12 : f32 to vector<1x8x128xf32>
    %10 = arith.select %8, %9, %6 : vector<1x8x128xi1>, vector<1x8x128xf32>
    %cst_13 = arith.constant dense<0xFF800000> : vector<1x8xf32>
    %11 = vector.multi_reduction <maximumf>, %10, %cst_13 [2] : vector<1x8x128xf32> to vector<1x8xf32>
    %12 = vector.shape_cast %11 : vector<1x8xf32> to vector<1x8x1xf32>
    %13 = vector.broadcast %12 : vector<1x8x1xf32> to vector<1x8x128xf32>
    %14 = arith.subf %10, %13 : vector<1x8x128xf32>
    %15 = math.exp %14 : vector<1x8x128xf32>
    %cst_14 = arith.constant dense<0.000000e+00> : vector<1x8xf32>
    %16 = vector.multi_reduction <add>, %15, %cst_14 [2] : vector<1x8x128xf32> to vector<1x8xf32>
    %17 = vector.shape_cast %16 : vector<1x8xf32> to vector<1x8x1xf32>
    %18 = tpu.reciprocal %17 : vector<1x8x1xf32> -> vector<1x8x1xf32>
    %19 = vector.broadcast %18 : vector<1x8x1xf32> to vector<1x8x128xf32>
    %20 = arith.mulf %15, %19 : vector<1x8x128xf32>
    "tpu.trace_start"() <{level = 10 : i32, message = "bqk,bkd->bqd"}> : () -> ()
    %cst_15 = arith.constant dense<0.000000e+00> : vector<1x8x32xf32>
    %21 = tpu.matmul %20, %2, %cst_15 {dimension_numbers = #tpu.dot_dimension_numbers<[2], [1], [1], [2], [0, 0, 0, 1, 1, 2], [0], [0]>} : vector<1x8x128xf32>, vector<1x128x32xf32>, vector<1x8x32xf32> -> vector<1x8x32xf32>
    "tpu.trace_stop"() : () -> ()
    %c0_16 = arith.constant 0 : index
    %c0_17 = arith.constant 0 : index
    %c0_18 = arith.constant 0 : index
    %22 = vector.load %arg7[%c0_16, %c0_17, %c0_18] : memref<1x8x128xf32, #tpu.memory_space<vmem>>, vector<1x8x128xf32>
    tpu.vector_store %arg7[%c0_16, %c0_17, %c0_18], %20 {strides = array<i32>} : memref<1x8x128xf32, #tpu.memory_space<vmem>>, vector<1x8x128xf32>,
    %c0_19 = arith.constant 0 : index
    %c0_20 = arith.constant 0 : index
    %c0_21 = arith.constant 0 : index
    %23 = vector.load %arg6[%c0_19, %c0_20, %c0_21] : memref<1x8x32xf32, #tpu.memory_space<vmem>>, vector<1x8x32xf32>
    tpu.vector_store %arg6[%c0_19, %c0_20, %c0_21], %21 {strides = array<i32>} : memref<1x8x32xf32, #tpu.memory_space<vmem>>, vector<1x8x32xf32>,
    return
  }
  func.func @transform_0(%arg0: i32, %arg1: i32) -> (i32, i32, i32) {
    %c0_i32 = arith.constant 0 : i32
    %c0_i32_0 = arith.constant 0 : i32
    return %arg0, %arg1, %c0_i32 : i32, i32, i32
  }
  func.func @transform_1(%arg0: i32, %arg1: i32) -> (i32, i32, i32) {
    %c0_i32 = arith.constant 0 : i32
    %c0_i32_0 = arith.constant 0 : i32
    %c0_i32_1 = arith.constant 0 : i32
    return %arg0, %c0_i32, %c0_i32_0 : i32, i32, i32
  }
  func.func @transform_2(%arg0: i32, %arg1: i32) -> (i32, i32, i32) {
    %c0_i32 = arith.constant 0 : i32
    %c0_i32_0 = arith.constant 0 : i32
    %c0_i32_1 = arith.constant 0 : i32
    return %arg0, %c0_i32, %c0_i32_0 : i32, i32, i32
  }
  func.func @transform_3(%arg0: i32, %arg1: i32) -> (i32, i32, i32) {
    %c0_i32 = arith.constant 0 : i32
    %c0_i32_0 = arith.constant 0 : i32
    return %arg0, %arg1, %c0_i32 : i32, i32, i32
  }
  func.func @transform_4(%arg0: i32, %arg1: i32) -> (i32, i32, i32) {
    %c0_i32 = arith.constant 0 : i32
    %c0_i32_0 = arith.constant 0 : i32
    return %arg0, %arg1, %c0_i32 : i32, i32, i32
  }
  func.func @transform_5(%arg0: i32, %arg1: i32) -> (i32, i32, i32) {
    %c0_i32 = arith.constant 0 : i32
    %c0_i32_0 = arith.constant 0 : i32
    return %arg0, %arg1, %c0_i32 : i32, i32, i32
  }
}

</mosaic_0001>

<bundles_post_ra>
// kernel: tpu_custom_call.1
= control target key start
LH: loop header
LB: loop body
LE: loop exit
PB: predicated region body
PF: predicated region fallthrough
CT: control target
= control target key end

     0   :  { %s1102_s0 = inlined_call_operand.vmem [shape: f32[2,8,32], index: 0, kind: input, shape index: {}]   ;;  %s1103_s1 = inlined_call_operand.vmem [shape: f32[2,128,32], index: 1, kind: input, shape index: {}]   ;;  %s1104_s2 = inlined_call_operand.vmem [shape: f32[2,128,32], index: 2, kind: input, shape index: {}]   ;;  %s1105_s3 = inlined_call_operand.vmem [shape: s8[2,8,128], index: 3, kind: input, shape index: {}]   ;;  %s1106_s4 = inlined_call_operand.hbm [shape: f32[2,8,32], index: 4, kind: output, shape index: {0}]   ;;  %s1107_s5 = inlined_call_operand.hbm [shape: f32[2,8,128], index: 5, kind: output, shape index: {1}]  }
   0x1   :  { %1108 = sst [smem:[#allocation8_spill]] %s1102_s0 }
   0x2   :  { %11 = vsyncpa [#allocation3], 0 }
   0x3   :  { %13 = vsyncpa [#allocation3 + $0x1], 0 }
   0x4   :  { %14 = vsyncpa [#allocation5], 0 }
   0x5   :  { %16 = vsyncpa [#allocation5 + $0x1], 0  ;;  %s911_s18 = smov 0   ;;  %s913_s19 = smov 0  }
   0x6   :  { %s915_s20 = smov 0   ;;  %s917_s21 = smov 0  }
   0x7   :  { %s919_s22 = smov 0   ;;  %s921_s23 = smov 0  }
   0x8 LB: > { %s665_s24 = sadd.s32 4294967295, %s878_s23   ;;  %s666_s25 = sadd.s32 4294967294, %s878_s23   ;;  %s878_s23 = sphi %s921_s23, %s22_s23   ;;  %s874_s22 = sphi %s919_s22, %s1116_s22   ;;  %s870_s21 = sphi %s917_s21, %s1115_s21   ;;  %s866_s20 = sphi %s915_s20, %s1114_s20   ;;  %s862_s19 = sphi %s913_s19, %s1113_s19   ;;  %s858_s18 = sphi %s911_s18, %s1112_s18  }
   0x9   : > { %s34_s26 = sadd.s32 1, %s874_s22  ;;  %s151_s27 = sadd.s32 1, %s866_s20 }
   0xa   : > { %p36_p0 = scmp.ge.s32.totalorder %s34_s26, 2  ;;  %p161_p1 = scmp.ne.s32.totalorder %s866_s20, %s862_s19 }
   0xb   : > { %p162_p2 = scmp.eq.s32.totalorder %s665_s24, 1  ;;  %p167_p3 = scmp.ne.s32.totalorder %s862_s19, %s858_s18 }
   0xc   : > { %s1118_s26 = smov (%p36_p0, %s34_s26), 0  ;;  %p168_p5 = scmp.eq.s32.totalorder %s666_s25, 1 }
   0xd   : > { %p951_p4 = por %p162_p2, %p161_p1  ;;  %s146_s29 = ssub.s32 %s874_s22, %s1118_s26 }
   0xe   : > { %p669_p6 = scmp.ge.s32.totalorder %s878_s23, 1  ;;  %p149_p7 = scmp.eq.s32.totalorder %s146_s29, 0 }
   0xf   : > { %p958_p8 = por %p168_p5, %p167_p3  ;;  %p250_p9 = scmp.lt.s32.totalorder %s878_s23, 3 }
  0x10   : > { %s964_s6 = scalar_select %p149_p7, %s866_s20, %s151_s27  }
  0x11   : > { %p251_p10 = pnand %p669_p6, %p250_p9 }
  0x12   : > { %p302_p11 = scmp.lt.s32.totalorder (!%p251_p10), %s870_s21, 1  ;;  %s1111_s0 = sld [smem:[#allocation8_spill]] (!%p251_p10) }
  0x13   : > { %254 = sbr.rel (%p251_p10) target bundleno = 610 (0x262), region = 36  ;;  %s697_s10 = sshll.u32 (!%p251_p10), %s870_s21, 3 }
  0x14   : > { %s516_s13 = scalar_lea.hbm (!%p251_p10), %s1107_s5, %s697_s10  ;;  %s788_s29 = scalar_lea.hbm (!%p251_p10), %s1107_s5, 16 }
  0x18   : > { %s968_s7 = scalar_select %p302_p11, %s870_s21, 1  ;;  %vm363_vm0 = vcmask 261120   ;;  %v880_v19 = vmov 0  }
  0x1a   : > { %s701_s8 = sshll.u32 %s968_s7, 7  ;;  %s672_s12 = sshll.u32 %s968_s7, 3 }
  0x1b   : > { %s976_s11 = scalar_lea.vmem %s1103_s1, %s701_s8  ;;  %s308_s15 = scalar_lea.vmem %s1111_s0, %s672_s12 }
  0x1c   : > { %v344_v0 = vld [vmem:[%s976_s11 + $0x78] sm:$0xff]  ;;  %v343_v1 = vld [vmem:[%s976_s11 + $0x70] sm:$0xff]  ;;  %v342_v2 = vld [vmem:[%s976_s11 + $0x68] sm:$0xff]  ;;  %s677_s16 = sshll.u32 %s968_s7, 1  ;;  %s1024_s9 = scalar_lea.vmem %s1104_s2, %s701_s8 }
  0x1d   : > { %678 = vmatpush.xpose.msk.msra.mxu0 %vm363_vm0, %v344_v0  ;;  %v341_v3 = vld [vmem:[%s976_s11 + $0x60] sm:$0xff]  ;;  %v340_v4 = vld [vmem:[%s976_s11 + $0x58] sm:$0xff]  ;;  %v339_v5 = vld [vmem:[%s976_s11 + $0x50] sm:$0xff]  ;;  %s325_s25 = scalar_lea.vmem %s1105_s3, %s677_s16  ;;  %s1043_s7 = sand.u32 1, %s862_s19  }
  0x1e   : > { %v338_v6 = vld [vmem:[%s976_s11 + $0x48] sm:$0xff]  ;;  %v337_v7 = vld [vmem:[%s976_s11 + $0x40] sm:$0xff]  ;;  %v336_v8 = vld [vmem:[%s976_s11 + $0x38] sm:$0xff]  ;;  %s670_s8 = sshll.u32 %s1043_s7, 3  ;;  %s520_s16 = sshll.u32 %s516_s13, 4  ;;  %s521_s16 = int_to_ptr.hbm [resolvable:$true] %s520_s16 }
  0x1f   : > { %v335_v9 = vld [vmem:[%s976_s11 + $0x30] sm:$0xff]  ;;  %v334_v10 = vld [vmem:[%s976_s11 + $0x28] sm:$0xff]  ;;  %v333_v11 = vld [vmem:[%s976_s11 + $0x20] sm:$0xff]  ;;  %s301_s14 = scalar_lea.vmem [#allocation4], %s670_s8  ;;  %s490_s17 = scalar_lea.sflag [#allocation5], %s1043_s7 }
  0x20   : > { %v332_v12 = vld [vmem:[%s976_s11 + $0x18] sm:$0xff]  ;;  %v331_v13 = vld [vmem:[%s976_s11 + $0x10] sm:$0xff]  ;;  %v330_v14 = vld [vmem:[%s976_s11 + $0x8] sm:$0xff]  ;;  %s782_s24 = sshra.s32 %s521_s16, 4  ;;  %s783_s24 = int_to_ptr.hbm [resolvable:$true] %s782_s24 }
  0x21   : > { %679 = vmatpush.xpose.msk.msra.mxu0 %vm363_vm0, %v343_v1  ;;  %v328_v15 = vld [vmem:[%s308_s15] sm:$0xff]  ;;  %v360_v24 = vld [vmem:[%s1024_s9 + $0x78] sm:$0xff]  ;;  %v359_v25 = vld [vmem:[%s1024_s9 + $0x70] sm:$0xff]  ;;  %s518_s15 = sshll.u32 %s301_s14, 4  ;;  %s784_s21 = scalar_lea.hbm %s783_s24, 8  ;;  %s519_s15 = int_to_ptr.vmem [resolvable:$true] %s518_s15 }
  0x22   : > { %v329_v16 = vld [vmem:[%s976_s11] sm:$0xff]  ;;  %v362_v17 = vmul.f32 0.17677669, %v328_v15  ;;  %462 = vmatpush.msra.mxu1 %v360_v24  ;;  %v358_v26 = vld [vmem:[%s1024_s9 + $0x68] sm:$0xff]  ;;  %v356_v28 = vld [vmem:[%s1024_s9 + $0x58] sm:$0xff]  ;;  %p785_p12 = scmp.ne.s32.totalorder %s783_s24, %s784_s21  ;;  %p789_p1 = scmp.lt.s32.totalorder %s783_s24, %s1107_s5 }
  0x23   : > { %v361_v18 = vld [vmem:[%s325_s25] sm:$0x3]  ;;  %v355_v29 = vld [vmem:[%s1024_s9 + $0x50] sm:$0xff]  ;;  %v354_v34 = vld [vmem:[%s1024_s9 + $0x48] sm:$0xff]  ;;  %p790_p2 = scmp.lt.s32.totalorder %s788_s29, %s784_s21 }
  0x24   : > { %vm435_vm1 = vnez %v361_v18  ;;  %463 = vmatpush.msra.mxu1 %v359_v25  ;;  %v357_v27 = vld [vmem:[%s1024_s9 + $0x60] sm:$0xff]  ;;  %v352_v36 = vld [vmem:[%s1024_s9 + $0x38] sm:$0xff]  ;;  %v351_v37 = vld [vmem:[%s1024_s9 + $0x30] sm:$0xff]  ;;  %p786_p13 = pnand %p785_p12, %p951_p4 }
  0x25   : > { %680 = vmatpush.xpose.msk.msra.mxu0 %vm363_vm0, %v342_v2  ;;  %v436_v20 = vsel %vm435_vm1, 16843009, %v880_v19  ;;  %v353_v35 = vld [vmem:[%s1024_s9 + $0x40] sm:$0xff]  ;;  %v350_v38 = vld [vmem:[%s1024_s9 + $0x28] sm:$0xff]  ;;  %v348_v40 = vld [vmem:[%s1024_s9 + $0x18] sm:$0xff]  ;;  %p791_p3 = por %p790_p2, %p789_p1 }
  0x26   : > { %v437_v21 = vunpack.c.0.s8 %v436_v20  ;;  %464 = vmatpush.msra.mxu1 %v358_v26  ;;  %v349_v39 = vld [vmem:[%s1024_s9 + $0x20] sm:$0xff]  ;;  %v347_v41 = vld [vmem:[%s1024_s9 + $0x10] sm:$0xff]  ;;  %v346_v42 = vld [vmem:[%s1024_s9 + $0x8] sm:$0xff]  ;;  %p787_p0 = pneg %p786_p13 }
  0x27   : > { %v345_v43 = vld [vmem:[%s1024_s9] sm:$0xff] }
  0x28   : > { %vm438_vm2 = vcmp.ne.s32.totalorder %v437_v21, 0  ;;  %465 = vmatpush.msra.mxu1 %v357_v27  ;;  %p792_p5 = pnand %p791_p3, %p787_p0 }
  0x29   : > { %681 = vmatpush.xpose.msk.msra.mxu0 %vm363_vm0, %v341_v3 }
  0x2a   : > { %466 = vmatpush.msra.mxu1 %v356_v28 }
  0x2c   : > { %467 = vmatpush.msra.mxu1 %v355_v29 }
  0x2d   : > { %682 = vmatpush.xpose.msk.msra.mxu0 %vm363_vm0, %v340_v4 }
  0x2e   : > { %468 = vmatpush.msra.mxu1 %v354_v34 }
  0x30   : > { %469 = vmatpush.msra.mxu1 %v353_v35 }
  0x31   : > { %683 = vmatpush.xpose.msk.msra.mxu0 %vm363_vm0, %v339_v5 }
  0x32   : > { %470 = vmatpush.msra.mxu1 %v352_v36 }
  0x34   : > { %471 = vmatpush.msra.mxu1 %v351_v37 }
  0x35   : > { %684 = vmatpush.xpose.msk.msra.mxu0 %vm363_vm0, %v338_v6 }
  0x36   : > { %472 = vmatpush.msra.mxu1 %v350_v38 }
  0x38   : > { %473 = vmatpush.msra.mxu1 %v349_v39 }
  0x39   : > { %685 = vmatpush.xpose.msk.msra.mxu0 %vm363_vm0, %v337_v7 }
  0x3a   : > { %474 = vmatpush.msra.mxu1 %v348_v40 }
  0x3c   : > { %475 = vmatpush.msra.mxu1 %v347_v41 }
  0x3d   : > { %686 = vmatpush.xpose.msk.msra.mxu0 %vm363_vm0, %v336_v8 }
  0x3e   : > { %476 = vmatpush.msra.mxu1 %v346_v42 }
  0x40   : > { %477 = vmatpush.msra.mxu1 %v345_v43 }
  0x41   : > { %687 = vmatpush.xpose.msk.msra.mxu0 %vm363_vm0, %v335_v9 }
  0x45   : > { %688 = vmatpush.xpose.msk.msra.mxu0 %vm363_vm0, %v334_v10 }
  0x49   : > { %689 = vmatpush.xpose.msk.msra.mxu0 %vm363_vm0, %v333_v11 }
  0x4d   : > { %690 = vmatpush.xpose.msk.msra.mxu0 %vm363_vm0, %v332_v12 }
  0x51   : > { %691 = vmatpush.xpose.msk.msra.mxu0 %vm363_vm0, %v331_v13 }
  0x55   : > { %692 = vmatpush.xpose.msk.msra.mxu0 %vm363_vm0, %v330_v14 }
  0x59   : > { %693 = vmatpush.xpose.msk.msra.mxu0 %vm363_vm0, %v329_v16 }
  0x5c   : > { %694 = vmatmul.msk.f32.vlgmr.msra.gmra.mxu0 %vm363_vm0, %v362_v17 }
  0xd9   : > { %v432_v22 = vpop.f32.mrf.mxu0 }
  0xda   : > { %v439_v23 = vsel %vm438_vm2, -1000000.0, %v432_v22 }
  0xdb   : > { %440 = vmax.xlane.f32.xlu0 %v439_v23 }
 0x14e   : > { %v441_v30 = vpop.xlane.xlu0 %440 }
 0x14f   : > { %v442_v31 = vsub.f32 %v439_v23, %v441_v30 }
 0x151   : > { %v443_v32 = vmul.f32 1.442695, %v442_v31 }
 0x153   : > { %764 = vpow2.f32 %v443_v32 }
 0x159   : > { %v765_v33 = vpop.eup %764 }
 0x15a   : > { %445 = vadd.xlane.f32.xlu0 %v765_v33 }
 0x1cd   : > { %v446_v44 = vpop.xlane.xlu0 %445 }
 0x1ce   : > { %766 = vrcp.f32 %v446_v44  ;;  %v458_v48 = vand.u32 2147483648, %v446_v44  ;;  %v456_v50 = vand.u32 2147483647, %v446_v44  ;;  %vm452_vm4 = vweird.f32 %v446_v44 }
 0x1d0   : > { %v459_v52 = vor.u32 1.1754944e-38, %v458_v48  ;;  %vm457_vm6 = vcmp.eq.f32.partialorder %v456_v50, 8.507059e+37 }
 0x1d4   : > { %v767_v45 = vpop.eup %766 }
 0x1d5   : > { %v448_v46 = vmul.f32 %v767_v45, %v446_v44  ;;  %vm453_vm3 = vweird.f32 %v767_v45 }
 0x1d6   : > { %vm454_vm5 = vmor %vm452_vm4, %vm453_vm3 }
 0x1d7   : > { %v449_v47 = vsub.f32 1.0, %v448_v46 }
 0x1d9   : > { %v450_v49 = vmul.f32 %v767_v45, %v449_v47 }
 0x1db   : > { %v451_v51 = vadd.f32 %v767_v45, %v450_v49 }
 0x1dd   : > { %v455_v53 = vsel %vm454_vm5, %v767_v45, %v451_v51 }
 0x1de   : > { %v460_v54 = vsel %vm457_vm6, %v459_v52, %v455_v53 }
 0x1df   : > { %v461_v55 = vmul.f32 %v765_v33, %v460_v54 }
 0x1e1   : > { %478 = vmatmul.f32.vlgmr.msra.gmra.mxu1 %v461_v55  ;;  %482 = vst [vmem:[%s301_s14] sm:$0xff] %v461_v55 }
 0x1e2   : > { %795 = shalt.err (!%p792_p5)
}
 0x1e3   : > { %704 = dma.vmem_to_hbm [thread:$0]  (%p951_p4), %s519_s15, 128, %s521_s16, %s490_s17  }
 0x1e4   : > { %s501_s14 = scalar_lea.hbm %s1106_s4, %s697_s10  ;;  %s294_s25 = scalar_lea.vmem [#allocation2], %s670_s8 }
 0x1e5   : > { %s503_s27 = sshll.u32 %s294_s25, 4  ;;  %s505_s0 = sshll.u32 %s501_s14, 4  ;;  %s504_s27 = int_to_ptr.vmem [resolvable:$true] %s503_s27  ;;  %s506_s0 = int_to_ptr.hbm [resolvable:$true] %s505_s0 }
 0x1e6   : > { %s485_s24 = scalar_lea.sflag [#allocation3], %s1043_s7  ;;  %s810_s21 = sshra.s32 %s506_s0, 4  ;;  %s811_s21 = int_to_ptr.hbm [resolvable:$true] %s810_s21 }
 0x1e7   : > { %s812_s29 = scalar_lea.hbm %s811_s21, 8  ;;  %s816_s10 = scalar_lea.hbm %s1106_s4, 16 }
 0x1e8   : > { %p813_p6 = scmp.ne.s32.totalorder %s811_s21, %s812_s29  ;;  %p817_p10 = scmp.lt.s32.totalorder %s811_s21, %s1106_s4 }
 0x1e9   : > { %p818_p11 = scmp.lt.s32.totalorder %s816_s10, %s812_s29 }
 0x1ea   : > { %p814_p7 = pnand %p813_p6, %p951_p4 }
 0x1eb   : > { %p819_p12 = por %p818_p11, %p817_p10 }
 0x1ec   : > { %p815_p9 = pneg %p814_p7 }
 0x1ee   : > { %p820_p13 = pnand %p819_p12, %p815_p9 }
 0x25e   : > { %v479_v56 = vpop.f32.mrf.mxu1 }
 0x25f   : > { %483 = vst.msk [vmem:[%s294_s25] sm:$0xff] %vm363_vm0, %v479_v56 }
 0x260   : > { %823 = shalt.err (!%p820_p13)
}
 0x261   : > { %703 = dma.vmem_to_hbm [thread:$0]  (%p951_p4), %s504_s27, 128, %s506_s0, %s485_s24  }
 0x262 PF: > { %p714_p0 = scmp.ge.s32.totalorder %s878_s23, 2  ;;  %s532_s7 = sand.u32 1, %s858_s18  }
 0x263   : > { %s533_s9 = scalar_lea.sflag [#allocation3], %s532_s7 }
 0x264   : > { %p708_p1 = pnand %p714_p0, %p958_p8 }
 0x266   : > { %p709_p2 = pneg %p708_p1 }
 0x268   : > { %849 = dma.done.wait (%p709_p2), %s533_s9, 128  }
 0x269   : > { %851 = vsyncadd (%p709_p2), %s533_s9, 4294967168  ;;  %s543_s11 = scalar_lea.sflag [#allocation5], %s532_s7 }
 0x26a   : > { %853 = dma.done.wait (%p709_p2), %s543_s11, 128  }
 0x26b   : > { %855 = vsyncadd (%p709_p2), %s543_s11, 4294967168  ;;  %s22_s23 = sadd.s32 1, %s878_s23   ;;  %s1112_s18 = smov %s862_s19 }
 0x26c   : > { %p19_p3 = scmp.ge.s32.totalorder %s22_s23, 4   ;;  %s1113_s19 = smov %s866_s20 }
 0x26d   : > { %s1114_s20 = smov %s964_s6  ;;  %s1115_s21 = smov %s874_s22 }
 0x26e   : > { %s1116_s22 = smov %s1118_s26  ;;  %21 = sbr.rel (!%p19_p3) target bundleno = 8 (0x8), region = 97 }
 0x273   :  { %549 = vsyncpa [#allocation3], 1 }
 0x274   :  { %551 = vsyncpa [#allocation3 + $0x1], 1 }
 0x275   :  { %552 = vsyncpa [#allocation5], 1 }
 0x276   :  { %554 = vsyncpa [#allocation5 + $0x1], 1 }

</bundles_post_ra>
